<compile_context>
chip_gen: v7x
topology: tpu7x:2x2x1
jax: 0.10.0
libtpu: 0.0.40
codegen_flags: <defaults>
</compile_context>

<pallas_src>
import math

import jax
import jax.numpy as jnp
from jax.experimental import pallas as pl
from jax.experimental.pallas import tpu as pltpu

_LANE = 128          # lane width (last dim of every tile)
_MAX_ROW_TILE = 1024  # ~7 MiB double-buffered working set across all 9 streams


def _elementwise_kernel(x_ref, y_ref, add_ref, sub_ref, mul_ref, div_ref,
                        gt_ref, lt_ref, eq_ref):
    x = x_ref[...]
    y = y_ref[...]
    add_ref[...] = x + y
    sub_ref[...] = x - y
    mul_ref[...] = x * y
    div_ref[...] = x / (y + jnp.asarray(1e-05, x.dtype))
    gt_ref[...] = x > y
    lt_ref[...] = x < y
    eq_ref[...] = x == y


def _pick_row_tile(rows):
    """Rows per grid step.

    Aim for >= 4 grid steps (so v7x's two TensorCores can split the "parallel"
    axis and the pipeline has iterations to overlap), keep the tile a multiple
    of 8 sublanes, and cap at _MAX_ROW_TILE to amortize per-step overhead over
    the 9 DMA streams without eating the scoped-VMEM headroom.
    """
    if rows <= 8:
        return rows                          # full-extent block; single step
    desired = max(8, -(-rows // 4))          # cdiv(rows, 4)
    desired = -(-desired // 8) * 8           # round up to sublane multiple
    return min(_MAX_ROW_TILE, desired)


def pt_module_forward(input_tensor1, input_tensor2):
    """Replicates PtModule.forward for same-shape float inputs."""
    assert input_tensor1.shape == input_tensor2.shape
    orig_shape = input_tensor1.shape
    dtype = input_tensor1.dtype
    n_elems = math.prod(orig_shape) if orig_shape else 1

    ragged = (n_elems % _LANE) != 0
    if ragged:
        # TODO(synk): mask the tail in-kernel (scalar-prefetch n_elems +
        # masked stores) instead of this pad/slice round trip; rare path.
        rows = pl.cdiv(n_elems, _LANE)
        padded = rows * _LANE
        x_flat = jnp.concatenate(
            [jnp.ravel(input_tensor1), jnp.zeros((padded - n_elems,), dtype)])
        # Pad y with ones so the padded region's divide stays finite.
        y_flat = jnp.concatenate(
            [jnp.ravel(input_tensor2), jnp.ones((padded - n_elems,), dtype)])
    else:
        rows = n_elems // _LANE
        x_flat = jnp.ravel(input_tensor1)
        y_flat = jnp.ravel(input_tensor2)

    x2d = x_flat.reshape(rows, _LANE)
    y2d = y_flat.reshape(rows, _LANE)

    row_tile = _pick_row_tile(rows)
    grid = (pl.cdiv(rows, row_tile),)
    blk = pl.BlockSpec((row_tile, _LANE), lambda i: (i, 0))

    f32_shape = jax.ShapeDtypeStruct((rows, _LANE), dtype)
    bool_shape = jax.ShapeDtypeStruct((rows, _LANE), jnp.bool_)

    itemsize = jnp.dtype(dtype).itemsize
    total = rows * _LANE
    cost = pl.CostEstimate(
        flops=7 * total,
        transcendentals=0,
        bytes_accessed=(2 * itemsize * total      # 2 float inputs
                        + 4 * itemsize * total    # 4 float outputs
                        + 3 * total))             # 3 byte-sized bool outputs

    outs = pl.pallas_call(
        _elementwise_kernel,
        grid=grid,
        out_shape=(f32_shape, f32_shape, f32_shape, f32_shape,
                   bool_shape, bool_shape, bool_shape),
        in_specs=[blk, blk],
        out_specs=(blk,) * 7,
        compiler_params=pltpu.CompilerParams(
            dimension_semantics=("parallel",),
            vmem_limit_bytes=32 * 1024 * 1024),
        cost_estimate=cost,
    )(x2d, y2d)

    if ragged:
        def unflatten(a):
            return a.reshape(-1)[:n_elems].reshape(orig_shape)
    else:
        def unflatten(a):
            return a.reshape(orig_shape)   # free: contiguous, no slice copy

    return tuple(unflatten(o) for o in outs)


if __name__ == "__main__":
    key = jax.random.PRNGKey(0)
    k1, k2 = jax.random.split(key)
    # NCHW inputs, small shapes: batch=2, channels=4, spatial=16x16
    x = jax.random.normal(k1, (2, 4, 16, 16), dtype=jnp.float32)
    y = jax.random.normal(k2, (2, 4, 16, 16), dtype=jnp.float32)
    # Inject some exact equalities so the == output is non-trivial.
    y = y.at[0, 0, 0, :].set(x[0, 0, 0, :])

    outs = pt_module_forward(x, y)
    jax.block_until_ready(outs)

    add, sub, mul, div, gt, lt, eq = outs
    # Reference check against plain JAX (mirrors the PyTorch semantics).
    assert jnp.allclose(add, x + y)
    assert jnp.allclose(sub, x - y)
    assert jnp.allclose(mul, x * y)
    assert jnp.allclose(div, x / (y + 1e-05))
    assert jnp.array_equal(gt, x > y)
    assert jnp.array_equal(lt, x < y)
    assert jnp.array_equal(eq, x == y)
    assert gt.dtype == jnp.bool_ and lt.dtype == jnp.bool_ and eq.dtype == jnp.bool_
    assert all(o.shape == x.shape for o in outs)

    print("KERNEL_OK")
</pallas_src>

<mosaic_0001>
module attributes {stable_mosaic.version = 11 : i64} {
  func.func @_elementwise_kernel(%arg0: i32, %arg1: memref<8x128xf32, #tpu.memory_space<vmem>>, %arg2: memref<8x128xf32, #tpu.memory_space<vmem>>, %arg3: memref<8x128xf32, #tpu.memory_space<vmem>>, %arg4: memref<8x128xf32, #tpu.memory_space<vmem>>, %arg5: memref<8x128xf32, #tpu.memory_space<vmem>>, %arg6: memref<8x128xf32, #tpu.memory_space<vmem>>, %arg7: memref<8x128xi32, #tpu.memory_space<vmem>>, %arg8: memref<8x128xi32, #tpu.memory_space<vmem>>, %arg9: memref<8x128xi32, #tpu.memory_space<vmem>>) attributes {dimension_semantics = [#tpu.dimension_semantics<parallel>], iteration_bounds = array<i64: 2>, scalar_prefetch = 0 : i64, scratch_operands = 0 : i64, tpu.core_type = #tpu.core_type<tc>, window_params = [{transform_indices = @transform_0, window_bounds = array<i64: 8, 128>}, {transform_indices = @transform_1, window_bounds = array<i64: 8, 128>}, {transform_indices = @transform_2, window_bounds = array<i64: 8, 128>}, {transform_indices = @transform_3, window_bounds = array<i64: 8, 128>}, {transform_indices = @transform_4, window_bounds = array<i64: 8, 128>}, {transform_indices = @transform_5, window_bounds = array<i64: 8, 128>}, {transform_indices = @transform_6, window_bounds = array<i64: 8, 128>}, {transform_indices = @transform_7, window_bounds = array<i64: 8, 128>}, {transform_indices = @transform_8, window_bounds = array<i64: 8, 128>}]} {
    %c0 = arith.constant 0 : index
    %c0_0 = arith.constant 0 : index
    %0 = vector.load %arg1[%c0, %c0_0] : memref<8x128xf32, #tpu.memory_space<vmem>>, vector<8x128xf32>
    %c0_1 = arith.constant 0 : index
    %c0_2 = arith.constant 0 : index
    %1 = vector.load %arg2[%c0_1, %c0_2] : memref<8x128xf32, #tpu.memory_space<vmem>>, vector<8x128xf32>
    %2 = arith.addf %0, %1 : vector<8x128xf32>
    %c0_3 = arith.constant 0 : index
    %c0_4 = arith.constant 0 : index
    %3 = vector.load %arg3[%c0_3, %c0_4] : memref<8x128xf32, #tpu.memory_space<vmem>>, vector<8x128xf32>
    tpu.vector_store %arg3[%c0_3, %c0_4], %2 {strides = array<i32>} : memref<8x128xf32, #tpu.memory_space<vmem>>, vector<8x128xf32>,
    %4 = arith.subf %0, %1 : vector<8x128xf32>
    %c0_5 = arith.constant 0 : index
    %c0_6 = arith.constant 0 : index
    %5 = vector.load %arg4[%c0_5, %c0_6] : memref<8x128xf32, #tpu.memory_space<vmem>>, vector<8x128xf32>
    tpu.vector_store %arg4[%c0_5, %c0_6], %4 {strides = array<i32>} : memref<8x128xf32, #tpu.memory_space<vmem>>, vector<8x128xf32>,
    %6 = arith.mulf %0, %1 : vector<8x128xf32>
    %c0_7 = arith.constant 0 : index
    %c0_8 = arith.constant 0 : index
    %7 = vector.load %arg5[%c0_7, %c0_8] : memref<8x128xf32, #tpu.memory_space<vmem>>, vector<8x128xf32>
    tpu.vector_store %arg5[%c0_7, %c0_8], %6 {strides = array<i32>} : memref<8x128xf32, #tpu.memory_space<vmem>>, vector<8x128xf32>,
    %cst = arith.constant 9.99999974E-6 : f32
    %8 = vector.broadcast %cst : f32 to vector<8x128xf32>
    %9 = arith.addf %1, %8 : vector<8x128xf32>
    %10 = arith.divf %0, %9 : vector<8x128xf32>
    %c0_9 = arith.constant 0 : index
    %c0_10 = arith.constant 0 : index
    %11 = vector.load %arg6[%c0_9, %c0_10] : memref<8x128xf32, #tpu.memory_space<vmem>>, vector<8x128xf32>
    tpu.vector_store %arg6[%c0_9, %c0_10], %10 {strides = array<i32>} : memref<8x128xf32, #tpu.memory_space<vmem>>, vector<8x128xf32>,
    %12 = arith.cmpf ogt, %0, %1 : vector<8x128xf32>
    %c0_11 = arith.constant 0 : index
    %c0_12 = arith.constant 0 : index
    %13 = vector.load %arg7[%c0_11, %c0_12] : memref<8x128xi32, #tpu.memory_space<vmem>>, vector<8x128xi32>
    %14 = arith.extui %12 : vector<8x128xi1> to vector<8x128xi32>
    %cst_13 = arith.constant dense<0> : vector<8x128xi32>
    %15 = arith.cmpi ne, %13, %cst_13 : vector<8x128xi32>
    tpu.vector_store %arg7[%c0_11, %c0_12], %14 {strides = array<i32>} : memref<8x128xi32, #tpu.memory_space<vmem>>, vector<8x128xi32>,
    %16 = arith.cmpf olt, %0, %1 : vector<8x128xf32>
    %c0_14 = arith.constant 0 : index
    %c0_15 = arith.constant 0 : index
    %17 = vector.load %arg8[%c0_14, %c0_15] : memref<8x128xi32, #tpu.memory_space<vmem>>, vector<8x128xi32>
    %18 = arith.extui %16 : vector<8x128xi1> to vector<8x128xi32>
    %cst_16 = arith.constant dense<0> : vector<8x128xi32>
    %19 = arith.cmpi ne, %17, %cst_16 : vector<8x128xi32>
    tpu.vector_store %arg8[%c0_14, %c0_15], %18 {strides = array<i32>} : memref<8x128xi32, #tpu.memory_space<vmem>>, vector<8x128xi32>,
    %20 = arith.cmpf oeq, %0, %1 : vector<8x128xf32>
    %c0_17 = arith.constant 0 : index
    %c0_18 = arith.constant 0 : index
    %21 = vector.load %arg9[%c0_17, %c0_18] : memref<8x128xi32, #tpu.memory_space<vmem>>, vector<8x128xi32>
    %22 = arith.extui %20 : vector<8x128xi1> to vector<8x128xi32>
    %cst_19 = arith.constant dense<0> : vector<8x128xi32>
    %23 = arith.cmpi ne, %21, %cst_19 : vector<8x128xi32>
    tpu.vector_store %arg9[%c0_17, %c0_18], %22 {strides = array<i32>} : memref<8x128xi32, #tpu.memory_space<vmem>>, vector<8x128xi32>,
    return
  }
  func.func @transform_0(%arg0: i32) -> (i32, i32) {
    %c0_i32 = arith.constant 0 : i32
    %c0_i32_0 = arith.constant 0 : i32
    return %arg0, %c0_i32 : i32, i32
  }
  func.func @transform_1(%arg0: i32) -> (i32, i32) {
    %c0_i32 = arith.constant 0 : i32
    %c0_i32_0 = arith.constant 0 : i32
    return %arg0, %c0_i32 : i32, i32
  }
  func.func @transform_2(%arg0: i32) -> (i32, i32) {
    %c0_i32 = arith.constant 0 : i32
    %c0_i32_0 = arith.constant 0 : i32
    return %arg0, %c0_i32 : i32, i32
  }
  func.func @transform_3(%arg0: i32) -> (i32, i32) {
    %c0_i32 = arith.constant 0 : i32
    %c0_i32_0 = arith.constant 0 : i32
    return %arg0, %c0_i32 : i32, i32
  }
  func.func @transform_4(%arg0: i32) -> (i32, i32) {
    %c0_i32 = arith.constant 0 : i32
    %c0_i32_0 = arith.constant 0 : i32
    return %arg0, %c0_i32 : i32, i32
  }
  func.func @transform_5(%arg0: i32) -> (i32, i32) {
    %c0_i32 = arith.constant 0 : i32
    %c0_i32_0 = arith.constant 0 : i32
    return %arg0, %c0_i32 : i32, i32
  }
  func.func @transform_6(%arg0: i32) -> (i32, i32) {
    %c0_i32 = arith.constant 0 : i32
    %c0_i32_0 = arith.constant 0 : i32
    return %arg0, %c0_i32 : i32, i32
  }
  func.func @transform_7(%arg0: i32) -> (i32, i32) {
    %c0_i32 = arith.constant 0 : i32
    %c0_i32_0 = arith.constant 0 : i32
    return %arg0, %c0_i32 : i32, i32
  }
  func.func @transform_8(%arg0: i32) -> (i32, i32) {
    %c0_i32 = arith.constant 0 : i32
    %c0_i32_0 = arith.constant 0 : i32
    return %arg0, %c0_i32 : i32, i32
  }
}

</mosaic_0001>

<bundles_post_ra>
// kernel: tpu_custom_call.1
= control target key start
LH: loop header
LB: loop body
LE: loop exit
PB: predicated region body
PF: predicated region fallthrough
CT: control target
= control target key end

     0   :  { %s1502_s0 = inlined_call_operand.hbm [shape: f32[16,128], index: 0, kind: input, shape index: {}]   ;;  %s1503_s1 = inlined_call_operand.hbm [shape: f32[16,128], index: 1, kind: input, shape index: {}]   ;;  %s1504_s2 = inlined_call_operand.hbm [shape: f32[16,128], index: 2, kind: output, shape index: {0}]   ;;  %s1505_s3 = inlined_call_operand.hbm [shape: f32[16,128], index: 3, kind: output, shape index: {1}]   ;;  %s1506_s4 = inlined_call_operand.hbm [shape: f32[16,128], index: 4, kind: output, shape index: {2}]   ;;  %s1507_s5 = inlined_call_operand.hbm [shape: f32[16,128], index: 5, kind: output, shape index: {3}]   ;;  %s1508_s6 = inlined_call_operand.vmem [shape: s32[16,128], index: 6, kind: output, shape index: {4}]   ;;  %s1509_s7 = inlined_call_operand.vmem [shape: s32[16,128], index: 7, kind: output, shape index: {5}]   ;;  %s1510_s8 = inlined_call_operand.vmem [shape: s32[16,128], index: 8, kind: output, shape index: {6}]  }
   0x1   :  { %1520 = sst [smem:[#allocation22_spill]] %s1502_s0 }
   0x2   :  { %1521 = sst [smem:[#allocation23_spill]] %s1503_s1 }
   0x3   :  { %1522 = sst [smem:[#allocation24_spill]] %s1505_s3 }
   0x4   :  { %14 = vsyncpa [#allocation3], 0 }
   0x5   :  { %16 = vsyncpa [#allocation3 + $0x1], 0 }
   0x6   :  { %17 = vsyncpa [#allocation6], 0 }
   0x7   :  { %19 = vsyncpa [#allocation6 + $0x1], 0 }
   0x8   :  { %20 = vsyncpa [#allocation4], 0 }
   0x9   :  { %22 = vsyncpa [#allocation4 + $0x1], 0 }
   0xa   :  { %23 = vsyncpa [#allocation9], 0 }
   0xb   :  { %25 = vsyncpa [#allocation9 + $0x1], 0 }
   0xc   :  { %26 = vsyncpa [#allocation12], 0 }
   0xd   :  { %28 = vsyncpa [#allocation12 + $0x1], 0  ;;  %s1156_s27 = smov 0   ;;  %s1158_s28 = smov 0  }
   0xe   :  { %s1160_s29 = smov 0   ;;  %s1162_s30 = smov 0  }
   0xf LB: > { %1523 = sst [smem:[#allocation18_spill]] %s1094_s28  ;;  %s1177_s9 = sadd.s32 4294967295, %s1102_s30   ;;  %s1102_s30 = sphi %s1162_s30, %s1546_s30   ;;  %s1098_s29 = sphi %s1160_s29, %s1549_s29   ;;  %s1094_s28 = sphi %s1158_s28, %s1548_s28   ;;  %s1090_s27 = sphi %s1156_s27, %s1547_s27  }
  0x10   : > { %1524 = sst [smem:[#allocation19_spill]] %s1098_s29  ;;  %s1511_s10 = sadd.s32 4294967294, %s1102_s30  }
  0x11   : > { %s1181_s11 = sadd.s32 1, %s1102_s30   ;;  %s41_s12 = sadd.s32 1, %s1098_s29 }
  0x12   : > { %1525 = sst [smem:[#allocation20_spill]] %s1181_s11  ;;  %s38_s13 = ssub.s32 %s1102_s30, %s1181_s11 }
  0x13   : > { %p48_p0 = scmp.ne.s32.totalorder %s1098_s29, %s1094_s28  ;;  %p39_p1 = scmp.eq.s32.totalorder %s38_s13, 0 }
  0x14   : > { %p49_p2 = scmp.eq.s32.totalorder %s1102_s30, 0  ;;  %p54_p3 = scmp.ne.s32.totalorder %s1094_s28, %s1090_s27 }
  0x15   : > { %p55_p4 = scmp.eq.s32.totalorder %s1177_s9, 0  ;;  %p104_p7 = scmp.eq.s32.totalorder %s1177_s9, 1 }
  0x16   : > { %s1193_s14 = scalar_select %p39_p1, %s1098_s29, %s41_s12  }
  0x17   : > { %p1195_p5 = por %p49_p2, %p48_p0  ;;  %p1199_p6 = por %p55_p4, %p54_p3 }
  0x18   : > { %1526 = sst [smem:[#allocation21_spill]] %s1193_s14  ;;  %p110_p8 = scmp.eq.s32.totalorder %s1511_s10, 1 }
  0x19   : > { %s1528_s16 = scalar_select %p1199_p6, 1, 0 }
  0x1a   : > { %p843_p10 = scmp.lt.s32.totalorder %s1102_s30, 2  ;;  %p1208_p11 = por %p104_p7, %p48_p0 }
  0x1b   : > { %p1212_p12 = por %p110_p8, %p54_p3  ;;  %s1217_s19 = sand.u32 1, %s1098_s29  }
  0x1c   : > { %s1529_s17 = scalar_select %p1208_p11, 1, 0 }
  0x1d   : > { %s1530_s18 = scalar_select %p1212_p12, 1, 0 }
  0x1e   : > { %s1513_s20 = sshll.u32 %s1102_s30, 7  ;;  %s1512_s21 = sshll.u32 %s1217_s19, 3 }
  0x1f   : > { %s1531_s0 = sld [smem:[#allocation22_spill]]  ;;  %s290_s25 = scalar_lea.vmem [#allocation2], %s1512_s21 }
  0x20   : > { %s297_s26 = sshll.u32 %s290_s25, 4  ;;  %p1232_p13 = pnand %p843_p10, %p1195_p5  ;;  %s1236_s26 = int_to_ptr.vmem [resolvable:$true] %s297_s26 }
  0x21   : > { %s287_s13 = scalar_lea.sflag [#allocation3], %s1217_s19 }
  0x22   : > { %p882_p3 = pneg %p1232_p13 }
  0x25   : > { %s1226_s24 = scalar_lea.hbm %s1531_s0, %s1513_s20  ;;  %s885_s25 = scalar_lea.hbm %s1531_s0, 256 }
  0x26   : > { %s880_s22 = scalar_lea.hbm %s1226_s24, 128  ;;  %p886_p5 = scmp.lt.u32.totalorder %s1226_s24, %s1531_s0 }
  0x27   : > { %p881_p2 = scmp.ne.s32.totalorder %s1226_s24, %s880_s22  ;;  %p887_p8 = scmp.lt.u32.totalorder %s885_s25, %s880_s22 }
  0x28   : > { %p889_p9 = scmp.lt.u32.totalorder %s880_s22, %s1226_s24 }
  0x29   : > { %p883_p4 = pnand %p882_p3, %p881_p2  ;;  %p888_p10 = por %p887_p8, %p886_p5 }
  0x2b   : > { %p884_p7 = pneg %p883_p4  ;;  %p890_p0 = por %p889_p9, %p888_p10 }
  0x2d   : > { %p891_p1 = pnand %p890_p0, %p884_p7 }
  0x2f   : > { %894 = shalt.err (!%p891_p1)
}
  0x30   : > { %s895_s20 = scalar_lea.vmem %s1236_s26, 128  ;;  %s1104_s15 = smov [#allocation2]  }
  0x31   : > { %p896_p2 = scmp.ne.s32.totalorder %s1236_s26, %s895_s20  ;;  %s900_s23 = sshll.u32 %s1104_s15, 4  ;;  %s901_s23 = int_to_ptr.vmem [resolvable:$false] %s900_s23 }
  0x32   : > { %s902_s10 = scalar_lea.vmem %s901_s23, 256  ;;  %p903_p11 = scmp.lt.s32.totalorder %s1236_s26, %s901_s23 }
  0x33   : > { %p898_p4 = pnand %p896_p2, %p882_p3  ;;  %p904_p5 = scmp.lt.s32.totalorder %s902_s10, %s895_s20 }
  0x35   : > { %p899_p12 = pneg %p898_p4  ;;  %p905_p8 = por %p904_p5, %p903_p11 }
  0x37   : > { %p906_p9 = pnand %p905_p8, %p899_p12 }
  0x39   : > { %909 = shalt.err (!%p906_p9)
}
  0x3a   : > { %826 = dma.hbm_to_vmem [thread:$0]  (!%p1232_p13), %s1226_s24, 128, %s1236_s26, %s287_s13  }
  0x3b   : > { %p1533_p0 = scmp.lt.s32.totalorder %s1102_s30, 3  ;;  %p1534_p1 = scmp.ge.s32.totalorder %s1102_s30, 1 }
  0x3c   : > { %s1536_s20 = sshll.u32 %s1102_s30, 7  ;;  %s1537_s1 = sld [smem:[#allocation23_spill]] }
  0x3d   : > { %p1270_p7 = pnand %p1534_p1, %p1533_p0  ;;  %s1538_s23 = sshll.u32 %s1217_s19, 3 }
  0x3e   : > { %s308_s10 = scalar_lea.vmem [#allocation5], %s1538_s23  ;;  %s305_s24 = scalar_lea.sflag [#allocation6], %s1217_s19 }
  0x3f   : > { %s1535_s21 = scalar_select %p1270_p7, 1, 0 }
  0x40   : > { %s315_s0 = sshll.u32 %s308_s10, 4  ;;  %s316_s0 = int_to_ptr.vmem [resolvable:$true] %s315_s0 }
  0x42   : > { %s1279_s15 = scalar_lea.hbm %s1537_s1, %s1536_s20  ;;  %s915_s20 = scalar_lea.hbm %s1537_s1, 256 }
  0x43   : > { %s910_s26 = scalar_lea.hbm %s1279_s15, 128  ;;  %p916_p2 = scmp.lt.u32.totalorder %s1279_s15, %s1537_s1 }
  0x44   : > { %p911_p11 = scmp.ne.s32.totalorder %s1279_s15, %s910_s26  ;;  %p917_p4 = scmp.lt.u32.totalorder %s915_s20, %s910_s26 }
  0x45   : > { %p919_p8 = scmp.lt.u32.totalorder %s910_s26, %s1279_s15 }
  0x46   : > { %p913_p12 = pnand %p911_p11, %p882_p3  ;;  %p918_p5 = por %p917_p4, %p916_p2 }
  0x48   : > { %p914_p10 = pneg %p913_p12  ;;  %p920_p9 = por %p919_p8, %p918_p5 }
  0x4a   : > { %p921_p0 = pnand %p920_p9, %p914_p10 }
  0x4c   : > { %924 = shalt.err (!%p921_p0)
}
  0x4d   : > { %s925_s19 = scalar_lea.vmem %s316_s0, 128  ;;  %s1105_s23 = smov [#allocation5]  }
  0x4e   : > { %p926_p1 = scmp.ne.s32.totalorder %s316_s0, %s925_s19  ;;  %s930_s14 = sshll.u32 %s1105_s23, 4  ;;  %s931_s14 = int_to_ptr.vmem [resolvable:$false] %s930_s14 }
  0x4f   : > { %s932_s10 = scalar_lea.vmem %s931_s14, 256  ;;  %p933_p6 = scmp.lt.s32.totalorder %s316_s0, %s931_s14 }
  0x50   : > { %p928_p11 = pnand %p926_p1, %p882_p3  ;;  %p934_p7 = scmp.lt.s32.totalorder %s932_s10, %s925_s19 }
  0x52   : > { %p929_p12 = pneg %p928_p11  ;;  %p935_p2 = por %p934_p7, %p933_p6 }
  0x54   : > { %p936_p4 = pnand %p935_p2, %p929_p12 }
  0x56   : > { %939 = shalt.err (!%p936_p4)
}
  0x57   : > { %829 = dma.hbm_to_vmem [thread:$0]  (!%p1232_p13), %s1279_s15, 128, %s316_s0, %s305_s24  }
  0x58   : > { %p1539_p10 = scmp.ne.s32.totalorder %s1535_s21, 0 }
  0x59   : > { %s1306_s26 = sand.u32 (!%p1539_p10), 1, %s1094_s28   ;;  %p1540_p6 = scmp.ne.s32.totalorder (!%p1539_p10), %s1528_s16, 0 }
  0x5a   : > { %324 = sbr.rel (%p1539_p10) target bundleno = 202 (0xca), region = 28  ;;  %s1309_s13 = sshll.u32 (!%p1539_p10), %s1306_s26, 3 }
  0x5b   : > { %s327_s20 = scalar_lea.sflag (!%p1539_p10), [#allocation3], %s1306_s26  ;;  %s330_s22 = scalar_lea.vmem (!%p1539_p10), [#allocation2], %s1309_s13 }
  0x61   : > { %1069 = dma.done.wait (%p1540_p6), %s327_s20, 128  }
  0x62   : > { %1071 = vsyncadd (%p1540_p6), %s327_s20, 4294967168  ;;  %s336_s0 = scalar_lea.sflag [#allocation6], %s1306_s26  ;;  %s339_s12 = scalar_lea.vmem [#allocation5], %s1309_s13 }
  0x63   : > { %1073 = dma.done.wait (%p1540_p6), %s336_s0, 128  }
  0x64   : > { %1075 = vsyncadd (%p1540_p6), %s336_s0, 4294967168  ;;  %s371_s21 = scalar_lea.vmem [#allocation8], %s1309_s13  ;;  %s364_s24 = scalar_lea.vmem [#allocation7], %s1309_s13  ;;  %v1334_v0 = vld [vmem:[%s330_s22] sm:$0xff]  ;;  %v417_v1 = vld [vmem:[%s339_s12] sm:$0xff] }
  0x65   : > { %s491_s15 = sshll.u32 %s371_s21, 4  ;;  %s478_s25 = sshll.u32 %s364_s24, 4  ;;  %v420_v2 = vsub.f32 %v1334_v0, %v417_v1  ;;  %v418_v3 = vadd.f32 %v417_v1, %v1334_v0  ;;  %v422_v4 = vmul.f32 %v417_v1, %v1334_v0  ;;  %v424_v5 = vadd.f32 1e-05, %v417_v1  ;;  %s1326_s15 = int_to_ptr.vmem [resolvable:$true] %s491_s15  ;;  %s1328_s25 = int_to_ptr.vmem [resolvable:$true] %s478_s25 }
  0x66   : > { %s378_s19 = scalar_lea.vmem [#allocation10], %s1309_s13  ;;  %s442_s14 = sand.u32 1, %s1177_s9   ;;  %vm428_vm0 = vcmp.gt.f32.partialorder %v1334_v0, %v417_v1  ;;  %vm431_vm1 = vcmp.lt.f32.partialorder %v1334_v0, %v417_v1  ;;  %vm434_vm2 = vcmp.eq.f32.partialorder %v1334_v0, %v417_v1 }
  0x67   : > { %s504_s23 = sshll.u32 %s378_s19, 4  ;;  %s1332_s10 = sshll.u32 %s1177_s9, 7  ;;  %421 = vst [vmem:[%s371_s21] sm:$0xff] %v420_v2  ;;  %419 = vst [vmem:[%s364_s24] sm:$0xff] %v418_v3  ;;  %878 = vrcp.f32 %v424_v5  ;;  %s1336_s23 = int_to_ptr.vmem [resolvable:$true] %s504_s23 }
  0x68   : > { %s1541_s3 = sld [smem:[#allocation24_spill]]  ;;  %p404_p13 = scmp.lt.s32.totalorder %s1177_s9, 1  ;;  %423 = vst [vmem:[%s378_s19] sm:$0xff] %v422_v4 }
  0x69   : > { %s1355_s1 = scalar_lea.hbm %s1504_s2, %s1332_s10  ;;  %s1360_s16 = scalar_lea.sflag [#allocation9], %s442_s14 }
  0x6a   : > { %s1551_s9 = smov (!%p404_p13, %s1177_s9), 1  ;;  %s940_s20 = scalar_lea.vmem %s1326_s15, 128 }
  0x6b   : > { %p941_p3 = scmp.ne.s32.totalorder %s1326_s15, %s940_s20  ;;  %p1542_p7 = scmp.ne.s32.totalorder %s1529_s17, 0 }
  0x6c   : > { %s1106_s29 = smov [#allocation8]  }
  0x6d   : > { %p942_p5 = pnand %p941_p3, %p1542_p7  ;;  %s944_s28 = sshll.u32 %s1106_s29, 4  ;;  %s945_s28 = int_to_ptr.vmem [resolvable:$false] %s944_s28 }
  0x6e   : > { %s1345_s0 = scalar_lea.hbm %s1541_s3, %s1332_s10  ;;  %s946_s22 = scalar_lea.vmem %s945_s28, 256 }
  0x6f   : > { %p943_p8 = pneg %p942_p5  ;;  %p947_p9 = scmp.lt.s32.totalorder %s1326_s15, %s945_s28 }
  0x70   : > { %p948_p0 = scmp.lt.s32.totalorder %s946_s22, %s940_s20 }
  0x72   : > { %p949_p1 = por %p948_p0, %p947_p9 }
  0x74   : > { %p950_p11 = pnand %p949_p1, %p943_p8 }
  0x76   : > { %953 = shalt.err (!%p950_p11)
}
  0x77   : > { %s954_s21 = scalar_lea.hbm %s1345_s0, 128  ;;  %s958_s29 = scalar_lea.hbm %s1541_s3, 256 }
  0x78   : > { %p955_p12 = scmp.ne.s32.totalorder %s1345_s0, %s954_s21  ;;  %p959_p10 = scmp.lt.u32.totalorder %s1345_s0, %s1541_s3 }
  0x79   : > { %p960_p6 = scmp.lt.u32.totalorder %s958_s29, %s954_s21  ;;  %p962_p3 = scmp.lt.u32.totalorder %s954_s21, %s1345_s0 }
  0x7a   : > { %p956_p2 = pnand %p955_p12, %p1542_p7 }
  0x7b   : > { %p961_p13 = por %p960_p6, %p959_p10 }
  0x7c   : > { %p957_p4 = pneg %p956_p2 }
  0x7d   : > { %p963_p5 = por %p962_p3, %p961_p13 }
  0x7f   : > { %p964_p8 = pnand %p963_p5, %p957_p4 }
  0x81   : > { %967 = shalt.err (!%p964_p8)
}
  0x82   : > { %816 = dma.vmem_to_hbm [thread:$0]  (%p1542_p7), %s1326_s15, 128, %s1345_s0, %s1360_s16   ;;  %v1107_v6 = vmov 0  }
  0x83   : > { %v429_v7 = vsel %vm428_vm0, 1, %v1107_v6  ;;  %v432_v8 = vsel %vm431_vm1, 1, %v1107_v6  ;;  %s798_s12 = sshll.u32 %s1551_s9, 3  ;;  %v435_v9 = vsel %vm434_vm2, 1, %v1107_v6  ;;  %s1395_s21 = scalar_lea.hbm %s1506_s4, %s1332_s10 }
  0x84   : > { %s407_s15 = scalar_lea.vmem %s1508_s6, %s798_s12  ;;  %s411_s14 = scalar_lea.vmem %s1509_s7, %s798_s12 }
  0x85   : > { %430 = vst [vmem:[%s407_s15] sm:$0xff] %v429_v7  ;;  %433 = vst [vmem:[%s411_s14] sm:$0xff] %v432_v8  ;;  %s415_s3 = scalar_lea.vmem %s1510_s8, %s798_s12  ;;  %s438_s11 = scalar_lea.sflag [#allocation4], %s1306_s26 }
  0x86   : > { %436 = vst [vmem:[%s415_s3] sm:$0xff] %v435_v9  ;;  %s968_s20 = scalar_lea.vmem %s1328_s25, 128  ;;  %s1108_s22 = smov [#allocation7]  }
  0x87   : > { %p969_p9 = scmp.ne.s32.totalorder %s1328_s25, %s968_s20  ;;  %s972_s24 = sshll.u32 %s1108_s22, 4  ;;  %s973_s24 = int_to_ptr.vmem [resolvable:$false] %s972_s24 }
  0x88   : > { %s974_s19 = scalar_lea.vmem %s973_s24, 256  ;;  %p975_p11 = scmp.lt.s32.totalorder %s1328_s25, %s973_s24 }
  0x89   : > { %p970_p0 = pnand %p969_p9, %p1542_p7  ;;  %p976_p12 = scmp.lt.s32.totalorder %s974_s19, %s968_s20 }
  0x8b   : > { %p971_p1 = pneg %p970_p0  ;;  %p977_p2 = por %p976_p12, %p975_p11 }
  0x8d   : > { %p978_p4 = pnand %p977_p2, %p971_p1 }
  0x8f   : > { %981 = shalt.err (!%p978_p4)
}
  0x90   : > { %s982_s3 = scalar_lea.hbm %s1355_s1, 128  ;;  %s986_s0 = scalar_lea.hbm %s1504_s2, 256 }
  0x91   : > { %p983_p10 = scmp.ne.s32.totalorder %s1355_s1, %s982_s3  ;;  %p987_p3 = scmp.lt.u32.totalorder %s1355_s1, %s1504_s2 }
  0x92   : > { %p988_p5 = scmp.lt.u32.totalorder %s986_s0, %s982_s3  ;;  %p990_p9 = scmp.lt.u32.totalorder %s982_s3, %s1355_s1 }
  0x93   : > { %p984_p6 = pnand %p983_p10, %p1542_p7 }
  0x94   : > { %p989_p8 = por %p988_p5, %p987_p3 }
  0x95   : > { %p985_p13 = pneg %p984_p6 }
  0x96   : > { %p991_p0 = por %p990_p9, %p989_p8 }
  0x98   : > { %p992_p1 = pnand %p991_p0, %p985_p13 }
  0x9a   : > { %995 = shalt.err (!%p992_p1)
}
  0x9b   : > { %815 = dma.vmem_to_hbm [thread:$0]  (%p1542_p7), %s1328_s25, 128, %s1355_s1, %s438_s11  }
  0x9c   : > { %s996_s9 = scalar_lea.vmem %s1336_s23, 128  ;;  %s1109_s28 = smov [#allocation10]  }
  0x9d   : > { %p997_p11 = scmp.ne.s32.totalorder %s1336_s23, %s996_s9  ;;  %s1000_s20 = sshll.u32 %s1109_s28, 4  ;;  %s1001_s20 = int_to_ptr.vmem [resolvable:$false] %s1000_s20 }
  0x9e   : > { %s1002_s22 = scalar_lea.vmem %s1001_s20, 256  ;;  %p1003_p4 = scmp.lt.s32.totalorder %s1336_s23, %s1001_s20 }
  0x9f   : > { %p998_p12 = pnand %p997_p11, %p1542_p7  ;;  %p1004_p10 = scmp.lt.s32.totalorder %s1002_s22, %s996_s9 }
  0xa1   : > { %p999_p2 = pneg %p998_p12  ;;  %p1005_p6 = por %p1004_p10, %p1003_p4 }
  0xa3   : > { %p1006_p13 = pnand %p1005_p6, %p999_p2 }
  0xa5   : > { %1009 = shalt.err (!%p1006_p13)
}
  0xa6   : > { %s1010_s1 = scalar_lea.hbm %s1395_s21, 128  ;;  %s1014_s24 = scalar_lea.hbm %s1506_s4, 256 }
  0xa7   : > { %p1011_p3 = scmp.ne.s32.totalorder %s1395_s21, %s1010_s1  ;;  %p1015_p9 = scmp.lt.u32.totalorder %s1395_s21, %s1506_s4 }
  0xa8   : > { %p1016_p0 = scmp.lt.u32.totalorder %s1014_s24, %s1010_s1  ;;  %p1018_p11 = scmp.lt.u32.totalorder %s1010_s1, %s1395_s21 }
  0xa9   : > { %p1012_p5 = pnand %p1011_p3, %p1542_p7 }
  0xaa   : > { %p1017_p1 = por %p1016_p0, %p1015_p9 }
  0xab   : > { %p1013_p8 = pneg %p1012_p5 }
  0xac   : > { %p1019_p12 = por %p1018_p11, %p1017_p1 }
  0xae   : > { %p1020_p2 = pnand %p1019_p12, %p1013_p8 }
  0xb0   : > { %1023 = shalt.err (!%p1020_p2)
}
  0xb1   : > { %817 = dma.vmem_to_hbm [thread:$0]  (%p1542_p7), %s1336_s23, 128, %s1395_s21, %s1360_s16   ;;  %v879_v10 = vpop.eup %878 }
  0xb2   : > { %s385_s12 = scalar_lea.vmem [#allocation11], %s1309_s13  ;;  %v426_v11 = vmul.f32 %v879_v10, %v1334_v0  ;;  %s1458_s14 = scalar_lea.hbm %s1507_s5, %s1332_s10 }
  0xb3   : > { %s517_s15 = sshll.u32 %s385_s12, 4  ;;  %s453_s9 = scalar_lea.sflag [#allocation12], %s1306_s26  ;;  %s1451_s15 = int_to_ptr.vmem [resolvable:$true] %s517_s15 }
  0xb4   : > { %427 = vst [vmem:[%s385_s12] sm:$0xff] %v426_v11  ;;  %s1024_s28 = scalar_lea.vmem %s1451_s15, 128  ;;  %s1110_s13 = smov [#allocation11]  }
  0xb5   : > { %p1025_p4 = scmp.ne.s32.totalorder %s1451_s15, %s1024_s28  ;;  %s1028_s23 = sshll.u32 %s1110_s13, 4  ;;  %s1029_s23 = int_to_ptr.vmem [resolvable:$false] %s1028_s23 }
  0xb6   : > { %s1030_s16 = scalar_lea.vmem %s1029_s23, 256  ;;  %p1031_p13 = scmp.lt.s32.totalorder %s1451_s15, %s1029_s23 }
  0xb7   : > { %p1026_p10 = pnand %p1025_p4, %p1542_p7  ;;  %p1032_p3 = scmp.lt.s32.totalorder %s1030_s16, %s1024_s28 }
  0xb9   : > { %p1027_p6 = pneg %p1026_p10  ;;  %p1033_p5 = por %p1032_p3, %p1031_p13 }
  0xbb   : > { %p1034_p8 = pnand %p1033_p5, %p1027_p6 }
  0xbd   : > { %1037 = shalt.err (!%p1034_p8)
}
  0xbe   : > { %s1038_s26 = scalar_lea.hbm %s1458_s14, 128  ;;  %s1042_s20 = scalar_lea.hbm %s1507_s5, 256 }
  0xbf   : > { %p1039_p9 = scmp.ne.s32.totalorder %s1458_s14, %s1038_s26  ;;  %p1043_p11 = scmp.lt.u32.totalorder %s1458_s14, %s1507_s5 }
  0xc0   : > { %p1044_p12 = scmp.lt.u32.totalorder %s1042_s20, %s1038_s26  ;;  %p1046_p4 = scmp.lt.u32.totalorder %s1038_s26, %s1458_s14 }
  0xc1   : > { %p1040_p0 = pnand %p1039_p9, %p1542_p7 }
  0xc2   : > { %p1045_p2 = por %p1044_p12, %p1043_p11 }
  0xc3   : > { %p1041_p1 = pneg %p1040_p0 }
  0xc4   : > { %p1047_p10 = por %p1046_p4, %p1045_p2 }
  0xc6   : > { %p1048_p6 = pnand %p1047_p10, %p1041_p1 }
  0xc8   : > { %1051 = shalt.err (!%p1048_p6)
}
  0xc9   : > { %818 = dma.vmem_to_hbm [thread:$0]  (%p1542_p7), %s1451_s15, 128, %s1458_s14, %s453_s9  }
  0xca PF: > { %s538_s11 = sand.u32 1, %s1090_s27   ;;  %p1543_p13 = scmp.ne.s32.totalorder %s1530_s18, 0 }
  0xcb   : > { %p1544_p3 = scmp.ge.s32.totalorder %s1102_s30, 2  ;;  %s539_s25 = scalar_lea.sflag [#allocation4], %s538_s11 }
  0xcd   : > { %p831_p5 = pnand %p1544_p3, %p1543_p13 }
  0xcf   : > { %1077 = dma.done.wait (!%p831_p5), %s539_s25, 128  }
  0xd0   : > { %1079 = vsyncadd (!%p831_p5), %s539_s25, 4294967168  ;;  %s1545_s24 = sadd.s32 4294967294, %s1102_s30  }
  0xd1   : > { %s547_s19 = sand.u32 1, %s1545_s24  }
  0xd2   : > { %s548_s3 = scalar_lea.sflag [#allocation9], %s547_s19 }
  0xd3   : > { %1081 = dma.done.wait (!%p831_p5), %s548_s3, 256  }
  0xd4   : > { %1083 = vsyncadd (!%p831_p5), %s548_s3, 4294967040  ;;  %s566_s17 = scalar_lea.sflag [#allocation12], %s538_s11 }
  0xd5   : > { %1085 = dma.done.wait (!%p831_p5), %s566_s17, 128  }
  0xd6   : > { %1087 = vsyncadd (!%p831_p5), %s566_s17, 4294967168  ;;  %s1546_s30 = sld [smem:[#allocation20_spill]]  ;;  %s1547_s27 = sld [smem:[#allocation18_spill]] }
  0xd7   : > { %s1548_s28 = sld [smem:[#allocation19_spill]]  ;;  %s1549_s29 = sld [smem:[#allocation21_spill]] }
  0xdc   : > { %p31_p7 = scmp.ge.s32.totalorder %s1546_s30, 4  }
  0xde   :  { %33 = sbr.rel (!%p31_p7) target bundleno = 15 (0xf), region = 171 }
  0xe5   :  { %592 = vsyncpa [#allocation3], 1 }
  0xe6   :  { %594 = vsyncpa [#allocation3 + $0x1], 1 }
  0xe7   :  { %595 = vsyncpa [#allocation6], 1 }
  0xe8   :  { %597 = vsyncpa [#allocation6 + $0x1], 1 }
  0xe9   :  { %598 = vsyncpa [#allocation4], 1 }
  0xea   :  { %600 = vsyncpa [#allocation4 + $0x1], 1 }
  0xeb   :  { %601 = vsyncpa [#allocation9], 1 }
  0xec   :  { %603 = vsyncpa [#allocation9 + $0x1], 1 }
  0xed   :  { %604 = vsyncpa [#allocation12], 1 }
  0xee   :  { %606 = vsyncpa [#allocation12 + $0x1], 1 }

</bundles_post_ra>
